<compile_context>
chip_gen: v6e
topology: v6e:2x2x1
jax: 0.10.0
libtpu: 0.0.40
codegen_flags: <defaults>
</compile_context>

<pallas_src>
import math

import jax
import jax.numpy as jnp
from jax.experimental import pallas as pl
from jax.experimental.pallas import tpu as pltpu


def _attn_kernel(q_ref, k_ref, v_ref, mask_ref, o_ref):
    """One grid step: a chunk of the batch, fully resident in VMEM.

    q_ref, k_ref : (Bc, S, S) f32
    v_ref        : (Bc, S, D) f32
    mask_ref     : (1,  S, S) f32   (broadcast over batch)
    o_ref        : (Bc, S, D)
    """
    m = mask_ref[0]                                    # (S, S)
    scale = 1.0 / math.sqrt(float(q_ref.shape[-1]))    # q5.size(-1) == S (as in module)

    # Bc is tiny (1 or 2) -> static unroll; each slice uses the proven 2-D
    # transpose (XLU vxpose) + 2-D MXU matmul lowering path.
    for i in range(q_ref.shape[0]):
        q = q_ref[i]                                   # (S, S)
        k = k_ref[i]                                   # (S, S)
        v = v_ref[i]                                   # (S, D)

        # qk = q + k^T / sqrt(d) + mask   (element-wise add, per the module)
        qk = q + k.T * scale + m

        # row-wise softmax along the last axis
        row_max = jnp.max(qk, axis=-1, keepdims=True)
        e = jnp.exp(qk - row_max)
        denom = jnp.sum(e, axis=-1, keepdims=True)
        p = e * pl.reciprocal(denom, approx=True)      # EUP vrcp, free slot

        # output = attn_weight @ v2   (MXU matmul)
        o_ref[i] = jnp.dot(p, v, preferred_element_type=jnp.float32).astype(
            o_ref.dtype
        )


def _batch_chunks(B: int) -> int:
    """Grid length over the batch.

    1 on single-TensorCore chips (v5e/v6e): one step, zero extra overhead.
    2 on chips whose two TensorCores shard a 'parallel' grid axis
    (v4 / v5p / v7x): one batch chunk per core.
    """
    if B < 2 or B % 2 != 0:
        return 1
    try:
        kind = jax.devices()[0].device_kind.lower()
    except Exception:
        return 1
    return 2 if any(tag in kind for tag in ("v4", "v5p", "7")) else 1


def attention_model(q5, k4, v2, mask):
    """q5,k4: (B,S,S) f32; v2: (B,S,D) f32; mask: (1,S,S) f32 -> (B,S,D)."""
    B, S, _ = q5.shape
    D = v2.shape[-1]

    chunks = _batch_chunks(B)
    Bc = B // chunks

    grid_spec = pltpu.PrefetchScalarGridSpec(
        num_scalar_prefetch=0,
        grid=(chunks,),
        in_specs=[
            pl.BlockSpec((Bc, S, S), lambda b: (b, 0, 0)),   # q5
            pl.BlockSpec((Bc, S, S), lambda b: (b, 0, 0)),   # k4
            pl.BlockSpec((Bc, S, D), lambda b: (b, 0, 0)),   # v2
            pl.BlockSpec((1, S, S), lambda b: (0, 0, 0)),    # mask (bcast over batch)
        ],
        out_specs=pl.BlockSpec((Bc, S, D), lambda b: (b, 0, 0)),
    )

    cost = pl.CostEstimate(
        flops=2 * B * S * S * D + 6 * B * S * S,             # matmul + softmax elementwise
        transcendentals=B * S * S,                           # exp
        bytes_accessed=4 * (2 * B * S * S + S * S + 2 * B * S * D),
    )

    return pl.pallas_call(
        _attn_kernel,
        out_shape=jax.ShapeDtypeStruct((B, S, D), q5.dtype),
        grid_spec=grid_spec,
        cost_estimate=cost,
        compiler_params=pltpu.CompilerParams(
            dimension_semantics=("parallel",),
        ),
    )(q5, k4, v2, mask)


def _reference(q5, k4, v2, mask):
    d = q5.shape[-1]
    qk = q5 + jnp.swapaxes(k4, -2, -1) / math.sqrt(float(d))
    qk = qk + mask
    attn = jax.nn.softmax(qk, axis=-1)
    return jnp.einsum("bij,bjd->bid", attn, v2)


if __name__ == "__main__":
    B, S, D = 2, 56, 32  # S=56 matches the module's mask (1, 56, 56)

    key = jax.random.PRNGKey(0)
    kq, kk, kv = jax.random.split(key, 3)
    q5 = jax.random.normal(kq, (B, S, S), dtype=jnp.float32)
    k4 = jax.random.normal(kk, (B, S, S), dtype=jnp.float32)
    v2 = jax.random.normal(kv, (B, S, D), dtype=jnp.float32)

    # In the PyTorch snippet, mask.fill_(-1e9) fills the whole tensor, so the
    # mask is a constant -1e9 everywhere.
    # NOTE (correctness concern, flagged): adding -1e9 to O(1) logits in f32
    # rounds the logits away (ulp(1e9)=64) -> near-uniform attention.  The
    # kernel keeps the add to match the module/reference exactly.
    mask = jnp.full((1, S, S), -1.0e9, dtype=jnp.float32)

    out = attention_model(q5, k4, v2, mask)
    jax.block_until_ready(out)

    ref = _reference(q5, k4, v2, mask)
    assert out.shape == (B, S, D)
    # approx reciprocal in the kernel -> slightly looser tolerance than 1e-5.
    assert jnp.allclose(out, ref, atol=5e-3, rtol=5e-3), "mismatch vs reference"

    print("KERNEL_OK")
</pallas_src>

<mosaic_0001>
module attributes {stable_mosaic.version = 11 : i64} {
  func.func @_attn_kernel(%arg0: i32, %arg1: memref<2x56x56xf32, #tpu.memory_space<vmem>>, %arg2: memref<2x56x56xf32, #tpu.memory_space<vmem>>, %arg3: memref<2x56x32xf32, #tpu.memory_space<vmem>>, %arg4: memref<1x56x56xf32, #tpu.memory_space<vmem>>, %arg5: memref<2x56x32xf32, #tpu.memory_space<vmem>>) attributes {dimension_semantics = [#tpu.dimension_semantics<parallel>], iteration_bounds = array<i64: 1>, scalar_prefetch = 0 : i64, scratch_operands = 0 : i64, tpu.core_type = #tpu.core_type<tc>, window_params = [{transform_indices = @transform_0, window_bounds = array<i64: 2, 56, 56>}, {transform_indices = @transform_1, window_bounds = array<i64: 2, 56, 56>}, {transform_indices = @transform_2, window_bounds = array<i64: 2, 56, 32>}, {pipeline_mode = #tpu.pipeline_mode<synchronous>, transform_indices = @transform_3, window_bounds = array<i64: 1, 56, 56>}, {transform_indices = @transform_4, window_bounds = array<i64: 2, 56, 32>}]} {
    %c0 = arith.constant 0 : index
    %c0_0 = arith.constant 0 : index
    %c0_1 = arith.constant 0 : index
    %0 = vector.load %arg4[%c0, %c0_0, %c0_1] : memref<1x56x56xf32, #tpu.memory_space<vmem>>, vector<1x56x56xf32>
    %1 = vector.shape_cast %0 : vector<1x56x56xf32> to vector<56x56xf32>
    %c0_2 = arith.constant 0 : index
    %c0_3 = arith.constant 0 : index
    %c0_4 = arith.constant 0 : index
    %2 = vector.load %arg1[%c0_2, %c0_3, %c0_4] : memref<2x56x56xf32, #tpu.memory_space<vmem>>, vector<1x56x56xf32>
    %3 = vector.shape_cast %2 : vector<1x56x56xf32> to vector<56x56xf32>
    %c0_5 = arith.constant 0 : index
    %c0_6 = arith.constant 0 : index
    %c0_7 = arith.constant 0 : index
    %4 = vector.load %arg2[%c0_5, %c0_6, %c0_7] : memref<2x56x56xf32, #tpu.memory_space<vmem>>, vector<1x56x56xf32>
    %5 = vector.shape_cast %4 : vector<1x56x56xf32> to vector<56x56xf32>
    %c0_8 = arith.constant 0 : index
    %c0_9 = arith.constant 0 : index
    %c0_10 = arith.constant 0 : index
    %6 = vector.load %arg3[%c0_8, %c0_9, %c0_10] : memref<2x56x32xf32, #tpu.memory_space<vmem>>, vector<1x56x32xf32>
    %7 = vector.shape_cast %6 : vector<1x56x32xf32> to vector<56x32xf32>
    %8 = tpu.transpose %5, [1, 0] : vector<56x56xf32> -> vector<56x56xf32>
    %cst = arith.constant 0.133630618 : f32
    %9 = vector.broadcast %cst : f32 to vector<56x56xf32>
    %10 = arith.mulf %8, %9 : vector<56x56xf32>
    %11 = arith.addf %3, %10 : vector<56x56xf32>
    %12 = arith.addf %11, %1 : vector<56x56xf32>
    %cst_11 = arith.constant dense<0xFF800000> : vector<56xf32>
    %13 = vector.multi_reduction <maximumf>, %12, %cst_11 [1] : vector<56x56xf32> to vector<56xf32>
    %14 = vector.shape_cast %13 : vector<56xf32> to vector<56x1xf32>
    %15 = vector.broadcast %14 : vector<56x1xf32> to vector<56x56xf32>
    %16 = arith.subf %12, %15 : vector<56x56xf32>
    %17 = math.exp %16 : vector<56x56xf32>
    %cst_12 = arith.constant dense<0.000000e+00> : vector<56xf32>
    %18 = vector.multi_reduction <add>, %17, %cst_12 [1] : vector<56x56xf32> to vector<56xf32>
    %19 = vector.shape_cast %18 : vector<56xf32> to vector<56x1xf32>
    %20 = tpu.reciprocal %19 {approx = true} : vector<56x1xf32> -> vector<56x1xf32>
    %21 = vector.broadcast %20 : vector<56x1xf32> to vector<56x56xf32>
    %22 = arith.mulf %17, %21 : vector<56x56xf32>
    %cst_13 = arith.constant dense<0.000000e+00> : vector<56x32xf32>
    %23 = tpu.matmul %22, %7, %cst_13 {dimension_numbers = #tpu.dot_dimension_numbers<[1], [0], [0], [1], [0, 0, 1, 1], [], []>} : vector<56x56xf32>, vector<56x32xf32>, vector<56x32xf32> -> vector<56x32xf32>
    %c0_14 = arith.constant 0 : index
    %c0_15 = arith.constant 0 : index
    %c0_16 = arith.constant 0 : index
    %24 = vector.load %arg5[%c0_14, %c0_15, %c0_16] : memref<2x56x32xf32, #tpu.memory_space<vmem>>, vector<1x56x32xf32>
    %25 = vector.shape_cast %24 : vector<1x56x32xf32> to vector<56x32xf32>
    %26 = vector.shape_cast %23 : vector<56x32xf32> to vector<1x56x32xf32>
    tpu.vector_store %arg5[%c0_14, %c0_15, %c0_16], %26 {strides = array<i32>} : memref<2x56x32xf32, #tpu.memory_space<vmem>>, vector<1x56x32xf32>,
    %c1 = arith.constant 1 : index
    %c0_17 = arith.constant 0 : index
    %c0_18 = arith.constant 0 : index
    %27 = vector.load %arg1[%c1, %c0_17, %c0_18] : memref<2x56x56xf32, #tpu.memory_space<vmem>>, vector<1x56x56xf32>
    %28 = vector.shape_cast %27 : vector<1x56x56xf32> to vector<56x56xf32>
    %c1_19 = arith.constant 1 : index
    %c0_20 = arith.constant 0 : index
    %c0_21 = arith.constant 0 : index
    %29 = vector.load %arg2[%c1_19, %c0_20, %c0_21] : memref<2x56x56xf32, #tpu.memory_space<vmem>>, vector<1x56x56xf32>
    %30 = vector.shape_cast %29 : vector<1x56x56xf32> to vector<56x56xf32>
    %c1_22 = arith.constant 1 : index
    %c0_23 = arith.constant 0 : index
    %c0_24 = arith.constant 0 : index
    %31 = vector.load %arg3[%c1_22, %c0_23, %c0_24] : memref<2x56x32xf32, #tpu.memory_space<vmem>>, vector<1x56x32xf32>
    %32 = vector.shape_cast %31 : vector<1x56x32xf32> to vector<56x32xf32>
    %33 = tpu.transpose %30, [1, 0] : vector<56x56xf32> -> vector<56x56xf32>
    %cst_25 = arith.constant 0.133630618 : f32
    %34 = vector.broadcast %cst_25 : f32 to vector<56x56xf32>
    %35 = arith.mulf %33, %34 : vector<56x56xf32>
    %36 = arith.addf %28, %35 : vector<56x56xf32>
    %37 = arith.addf %36, %1 : vector<56x56xf32>
    %cst_26 = arith.constant dense<0xFF800000> : vector<56xf32>
    %38 = vector.multi_reduction <maximumf>, %37, %cst_26 [1] : vector<56x56xf32> to vector<56xf32>
    %39 = vector.shape_cast %38 : vector<56xf32> to vector<56x1xf32>
    %40 = vector.broadcast %39 : vector<56x1xf32> to vector<56x56xf32>
    %41 = arith.subf %37, %40 : vector<56x56xf32>
    %42 = math.exp %41 : vector<56x56xf32>
    %cst_27 = arith.constant dense<0.000000e+00> : vector<56xf32>
    %43 = vector.multi_reduction <add>, %42, %cst_27 [1] : vector<56x56xf32> to vector<56xf32>
    %44 = vector.shape_cast %43 : vector<56xf32> to vector<56x1xf32>
    %45 = tpu.reciprocal %44 {approx = true} : vector<56x1xf32> -> vector<56x1xf32>
    %46 = vector.broadcast %45 : vector<56x1xf32> to vector<56x56xf32>
    %47 = arith.mulf %42, %46 : vector<56x56xf32>
    %cst_28 = arith.constant dense<0.000000e+00> : vector<56x32xf32>
    %48 = tpu.matmul %47, %32, %cst_28 {dimension_numbers = #tpu.dot_dimension_numbers<[1], [0], [0], [1], [0, 0, 1, 1], [], []>} : vector<56x56xf32>, vector<56x32xf32>, vector<56x32xf32> -> vector<56x32xf32>
    %c1_29 = arith.constant 1 : index
    %c0_30 = arith.constant 0 : index
    %c0_31 = arith.constant 0 : index
    %49 = vector.load %arg5[%c1_29, %c0_30, %c0_31] : memref<2x56x32xf32, #tpu.memory_space<vmem>>, vector<1x56x32xf32>
    %50 = vector.shape_cast %49 : vector<1x56x32xf32> to vector<56x32xf32>
    %51 = vector.shape_cast %48 : vector<56x32xf32> to vector<1x56x32xf32>
    tpu.vector_store %arg5[%c1_29, %c0_30, %c0_31], %51 {strides = array<i32>} : memref<2x56x32xf32, #tpu.memory_space<vmem>>, vector<1x56x32xf32>,
    return
  }
  func.func @transform_0(%arg0: i32) -> (i32, i32, i32) {
    %c0_i32 = arith.constant 0 : i32
    %c0_i32_0 = arith.constant 0 : i32
    %c0_i32_1 = arith.constant 0 : i32
    return %arg0, %c0_i32, %c0_i32_0 : i32, i32, i32
  }
  func.func @transform_1(%arg0: i32) -> (i32, i32, i32) {
    %c0_i32 = arith.constant 0 : i32
    %c0_i32_0 = arith.constant 0 : i32
    %c0_i32_1 = arith.constant 0 : i32
    return %arg0, %c0_i32, %c0_i32_0 : i32, i32, i32
  }
  func.func @transform_2(%arg0: i32) -> (i32, i32, i32) {
    %c0_i32 = arith.constant 0 : i32
    %c0_i32_0 = arith.constant 0 : i32
    %c0_i32_1 = arith.constant 0 : i32
    return %arg0, %c0_i32, %c0_i32_0 : i32, i32, i32
  }
  func.func @transform_3(%arg0: i32) -> (i32, i32, i32) {
    %c0_i32 = arith.constant 0 : i32
    %c0_i32_0 = arith.constant 0 : i32
    %c0_i32_1 = arith.constant 0 : i32
    %c0_i32_2 = arith.constant 0 : i32
    return %c0_i32, %c0_i32_0, %c0_i32_1 : i32, i32, i32
  }
  func.func @transform_4(%arg0: i32) -> (i32, i32, i32) {
    %c0_i32 = arith.constant 0 : i32
    %c0_i32_0 = arith.constant 0 : i32
    %c0_i32_1 = arith.constant 0 : i32
    return %arg0, %c0_i32, %c0_i32_0 : i32, i32, i32
  }
}

</mosaic_0001>

<bundles_post_ra>
// kernel: tpu_custom_call.1
= control target key start
LH: loop header
LB: loop body
LE: loop exit
PB: predicated region body
PF: predicated region fallthrough
CT: control target
= control target key end

     0   :  { %9 = vsyncpa [#allocation3], 0  ;;  %s823_s15 = smov [#allocation2]   ;;  %s1213_s0 = inlined_call_operand.vmem [shape: f32[2,56,56], index: 0, kind: input, shape index: {}]   ;;  %s1214_s1 = inlined_call_operand.hbm [shape: f32[2,56,56], index: 1, kind: input, shape index: {}]   ;;  %s1215_s2 = inlined_call_operand.vmem [shape: f32[2,56,32], index: 2, kind: input, shape index: {}]   ;;  %s1216_s3 = inlined_call_operand.vmem [shape: f32[1,56,56], index: 3, kind: input, shape index: {}]   ;;  %s1217_s4 = inlined_call_operand.vmem [shape: f32[2,56,32], index: 4, kind: output, shape index: {}]  }
   0x1   :  { %s17_s16 = sshll.u32 %s823_s15, 4  ;;  %s18_s16 = int_to_ptr.vmem [resolvable:$true] %s17_s16 }
   0x2   :  { %s809_s17 = scalar_lea.vmem %s18_s16, 1792  ;;  %p814_p1 = scmp.lt.s32.totalorder %s18_s16, %s18_s16 }
   0x3   :  { %p810_p0 = scmp.ne.s32.totalorder %s18_s16, %s809_s17  ;;  %p815_p2 = scmp.lt.s32.totalorder %s809_s17, %s809_s17 }
   0x5   :  { %p816_p3 = por %p815_p2, %p814_p1 }
   0x7   :  { %p817_p4 = pnand %p816_p3, %p810_p0 }
   0x9   :  { %820 = shalt.err (!%p817_p4)
}
   0xa   :  { %s824_s18 = smov 128   ;;  %s825_s19 = smov 8  }
   0xb   :  { %23 = dma.hbm_to_vmem [thread:$0]  %s1214_s1, 1792, %s18_s16, [#allocation3], %s824_s18, %s824_s18, %s825_s19  }
   0xc   :  { %821 = dma.done.wait [#allocation3], 1792  }
   0xd   :  { %822 = vsyncadd [#allocation3], 4294965504  ;;  %v328_v0 = vld [vmem:[#allocation2 + $0x38] sm:$0xff]  ;;  %v45_v1 = vld [vmem:[#allocation2] sm:$0xff]  ;;  %vm112_vm0 = vcmask 457728   ;;  %vm827_vm1 = vmmov 0  }
   0xe   :  { %343 = vxpose.xlu1.b32.start [1/7] (short) (narrow) %v328_v0, 56  ;;  %59 = vxpose.xlu0.b32.start [1/7] (short) (narrow) %v45_v1, 56  ;;  %v329_v2 = vld [vmem:[#allocation2 + $0x40] sm:$0xff]  ;;  %v46_v3 = vld [vmem:[#allocation2 + $0x8] sm:$0xff]  ;;  %v47_v5 = vld [vmem:[#allocation2 + $0x10] sm:$0xff]  ;;  %vm311_vm2 = vcmask 261120  }
   0xf   :  { %v330_v4 = vld [vmem:[#allocation2 + $0x48] sm:$0xff]  ;;  %v331_v6 = vld [vmem:[#allocation2 + $0x50] sm:$0xff]  ;;  %v48_v7 = vld [vmem:[#allocation2 + $0x18] sm:$0xff] }
  0x10   :  { %v332_v8 = vld [vmem:[#allocation2 + $0x58] sm:$0xff]  ;;  %v49_v9 = vld [vmem:[#allocation2 + $0x20] sm:$0xff]  ;;  %v50_v11 = vld [vmem:[#allocation2 + $0x28] sm:$0xff] }
  0x11   :  { %v333_v10 = vld [vmem:[#allocation2 + $0x60] sm:$0xff]  ;;  %v334_v12 = vld [vmem:[#allocation2 + $0x68] sm:$0xff]  ;;  %v51_v13 = vld [vmem:[#allocation2 + $0x30] sm:$0xff] }
  0x12   :  { %344 = vxpose.xlu1.b32.cont [2/7] (short) (narrow) %v329_v2, 56  ;;  %60 = vxpose.xlu0.b32.cont [2/7] (short) (narrow) %v46_v3, 56  ;;  %v614_v15 = vld [vmem:[%s1213_s0 + $0x38] sm:$0xff]  ;;  %v38_v17 = vld [vmem:[%s1213_s0] sm:$0xff]  ;;  %v39_v24 = vld [vmem:[%s1213_s0 + $0x8] sm:$0xff] }
  0x13   :  { %v31_v20 = vld [vmem:[%s1216_s3] sm:$0xff]  ;;  %v32_v31 = vld [vmem:[%s1216_s3 + $0x8] sm:$0xff]  ;;  %v40_v37 = vld [vmem:[%s1213_s0 + $0x10] sm:$0xff] }
  0x14   :  { %v615_v26 = vld [vmem:[%s1213_s0 + $0x40] sm:$0xff]  ;;  %v616_v39 = vld [vmem:[%s1213_s0 + $0x48] sm:$0xff]  ;;  %v33_v44 = vld [vmem:[%s1216_s3 + $0x10] sm:$0xff] }
  0x15   :  { %v41_v49 = vld [vmem:[%s1213_s0 + $0x18] sm:$0xff]  ;;  %v617_v51 = vld [vmem:[%s1213_s0 + $0x50] sm:$0xff]  ;;  %v42_v62 = vld [vmem:[%s1213_s0 + $0x20] sm:$0xff] }
  0x16   :  { %345 = vxpose.xlu1.b32.cont [3/7] (short) (narrow) %v330_v4, 56  ;;  %61 = vxpose.xlu0.b32.cont [3/7] (short) (narrow) %v47_v5, 56  ;;  %v34_v57 = vld [vmem:[%s1216_s3 + $0x18] sm:$0xff] }
  0x17   :  { %v618_v0 = vld [vmem:[%s1213_s0 + $0x58] sm:$0xff] }
  0x1a   :  { %346 = vxpose.xlu1.b32.cont [4/7] (short) (narrow) %v331_v6, 56  ;;  %62 = vxpose.xlu0.b32.cont [4/7] (short) (narrow) %v48_v7, 56  ;;  %v35_v6 = vld [vmem:[%s1216_s3 + $0x20] sm:$0xff] }
  0x1e   :  { %347 = vxpose.xlu1.b32.cont [5/7] (short) (narrow) %v332_v8, 56  ;;  %63 = vxpose.xlu0.b32.cont [5/7] (short) (narrow) %v49_v9, 56 }
  0x22   :  { %348 = vxpose.xlu1.b32.cont [6/7] (short) (narrow) %v333_v10, 56  ;;  %64 = vxpose.xlu0.b32.cont [6/7] (short) (narrow) %v50_v11, 56  ;;  %v43_v11 = vld [vmem:[%s1213_s0 + $0x28] sm:$0xff] }
  0x26   :  { %349 = vxpose.xlu1.b32.end [7/7] (short) (narrow) %v334_v12, 56  ;;  %65 = vxpose.xlu0.b32.end [7/7] (short) (narrow) %v51_v13, 56  ;;  %v619_v13 = vld [vmem:[%s1213_s0 + $0x60] sm:$0xff] }
  0x8a   :  { %v359_v14 = vpop.trf.xlu1  ;;  %v75_v16 = vpop.trf.xlu0 }
  0x8b   :  { %v375_v18 = vmul.f32 0.13363062, %v359_v14  ;;  %v91_v19 = vmul.f32 0.13363062, %v75_v16 }
  0x8d   :  { %v382_v21 = vadd.f32 %v614_v15, %v375_v18  ;;  %v98_v22 = vadd.f32 %v91_v19, %v38_v17  ;;  %v36_v19 = vld [vmem:[%s1216_s3 + $0x28] sm:$0xff] }
  0x8e   :  { %v76_v23 = vpop.trf.xlu0  ;;  %v360_v25 = vpop.trf.xlu1 }
  0x8f   :  { %v92_v27 = vmul.f32 0.13363062, %v76_v23  ;;  %v376_v28 = vmul.f32 0.13363062, %v360_v25  ;;  %v871_v29 = vadd.f32 %v382_v21, %v31_v20  ;;  %v873_v30 = vadd.f32 %v98_v22, %v31_v20 }
  0x91   :  { %v99_v32 = vadd.f32 %v92_v27, %v39_v24  ;;  %v383_v33 = vadd.f32 %v615_v26, %v376_v28  ;;  %v396_v34 = vsel %vm112_vm0, %v871_v29, -inf  ;;  %v113_v35 = vsel %vm112_vm0, %v873_v30, -inf  ;;  %v44_v24 = vld [vmem:[%s1213_s0 + $0x30] sm:$0xff]  ;;  %v620_v26 = vld [vmem:[%s1213_s0 + $0x68] sm:$0xff] }
  0x92   :  { %v77_v36 = vpop.trf.xlu0  ;;  %397 = vmax.xlane.f32.xlu1 %v396_v34  ;;  %114 = vmax.xlane.f32.xlu0 %v113_v35  ;;  %v361_v38 = vpop.trf.xlu1  ;;  %v37_v34 = vld [vmem:[%s1216_s3 + $0x30] sm:$0xff] }
  0x93   :  { %v93_v40 = vmul.f32 0.13363062, %v77_v36  ;;  %v377_v41 = vmul.f32 0.13363062, %v361_v38  ;;  %v888_v42 = vadd.f32 %v99_v32, %v32_v31  ;;  %v890_v43 = vadd.f32 %v383_v33, %v32_v31 }
  0x95   :  { %v100_v45 = vadd.f32 %v93_v40, %v40_v37  ;;  %v384_v46 = vadd.f32 %v616_v39, %v377_v41  ;;  %v116_v47 = vsel %vm112_vm0, %v888_v42, -inf  ;;  %v399_v52 = vsel %vm112_vm0, %v890_v43, -inf }
  0x96   :  { %v78_v48 = vpop.trf.xlu0  ;;  %117 = vmax.xlane.f32.xlu1 %v116_v47  ;;  %v362_v50 = vpop.trf.xlu1 }
  0x97   :  { %v94_v53 = vmul.f32 0.13363062, %v78_v48  ;;  %v378_v54 = vmul.f32 0.13363062, %v362_v50  ;;  %v905_v55 = vadd.f32 %v100_v45, %v33_v44  ;;  %v907_v56 = vadd.f32 %v384_v46, %v33_v44 }
  0x99   :  { %v101_v58 = vadd.f32 %v94_v53, %v41_v49  ;;  %v385_v59 = vadd.f32 %v617_v51, %v378_v54  ;;  %v119_v60 = vsel %vm112_vm0, %v905_v55, -inf  ;;  %v402_v1 = vsel %vm112_vm0, %v907_v56, -inf }
  0x9a   :  { %v79_v61 = vpop.trf.xlu0  ;;  %400 = vmax.xlane.f32.xlu1 %v399_v52  ;;  %120 = vmax.xlane.f32.xlu0 %v119_v60  ;;  %v363_v63 = vpop.trf.xlu1 }
  0x9b   :  { %v95_v2 = vmul.f32 0.13363062, %v79_v61  ;;  %v379_v3 = vmul.f32 0.13363062, %v363_v63  ;;  %v922_v4 = vadd.f32 %v101_v58, %v34_v57  ;;  %v924_v5 = vadd.f32 %v385_v59, %v34_v57 }
  0x9d   :  { %v102_v7 = vadd.f32 %v95_v2, %v42_v62  ;;  %v386_v8 = vadd.f32 %v618_v0, %v379_v3  ;;  %v122_v9 = vsel %vm112_vm0, %v922_v4, -inf  ;;  %v405_v14 = vsel %vm112_vm0, %v924_v5, -inf }
  0x9e   :  { %v80_v10 = vpop.trf.xlu0  ;;  %403 = vmax.xlane.f32.xlu1 %v402_v1  ;;  %123 = vmax.xlane.f32.xlu0 %v122_v9  ;;  %v364_v12 = vpop.trf.xlu1 }
  0x9f   :  { %v96_v15 = vmul.f32 0.13363062, %v80_v10  ;;  %v380_v16 = vmul.f32 0.13363062, %v364_v12  ;;  %v939_v17 = vadd.f32 %v102_v7, %v35_v6  ;;  %v941_v18 = vadd.f32 %v386_v8, %v35_v6 }
  0xa1   :  { %v103_v20 = vadd.f32 %v96_v15, %v43_v11  ;;  %v387_v21 = vadd.f32 %v619_v13, %v380_v16  ;;  %v125_v22 = vsel %vm112_vm0, %v939_v17, -inf  ;;  %v408_v27 = vsel %vm112_vm0, %v941_v18, -inf }
  0xa2   :  { %v81_v23 = vpop.trf.xlu0  ;;  %406 = vmax.xlane.f32.xlu1 %v405_v14  ;;  %126 = vmax.xlane.f32.xlu0 %v125_v22  ;;  %v365_v25 = vpop.trf.xlu1 }
  0xa3   :  { %v97_v28 = vmul.f32 0.13363062, %v81_v23  ;;  %v381_v31 = vmul.f32 0.13363062, %v365_v25  ;;  %v956_v32 = vadd.f32 %v103_v20, %v36_v19  ;;  %v958_v33 = vadd.f32 %v387_v21, %v36_v19 }
  0xa5   :  { %v104_v35 = vadd.f32 %v97_v28, %v44_v24  ;;  %v388_v36 = vadd.f32 %v620_v26, %v381_v31  ;;  %v128_v37 = vsel %vm112_vm0, %v956_v32, -inf  ;;  %v411_v38 = vsel %vm112_vm0, %v958_v33, -inf }
  0xa6   :  { %409 = vmax.xlane.f32.xlu1 %v408_v27  ;;  %129 = vmax.xlane.f32.xlu0 %v128_v37  ;;  %v826_v37 = vmov 0.0  }
  0xa7   :  { %v967_v39 = vadd.f32 %v104_v35, %v37_v34  ;;  %v969_v40 = vadd.f32 %v388_v36, %v37_v34  ;;  %v58_v34 = vld [vmem:[%s1215_s2 + $0x30] sm:$0xff]  ;;  %v627_v35 = vld [vmem:[%s1215_s2 + $0x68] sm:$0xff]  ;;  %670 = vmatprep.subr.mxu0 %v826_v37  ;;  %705 = vmatprep.subr.mxu1 %v826_v37 }
  0xa8   :  { %671 = vmatpush3.msra.mxu0 %v58_v34  ;;  %706 = vmatpush3.msra.mxu1 %v627_v35 }
  0xa9   :  { %v131_v41 = vsel %vm112_vm0, %v967_v39, -inf  ;;  %v414_v44 = vsel %vm112_vm0, %v969_v40, -inf  ;;  %672 = vmatprep.subr.mxu0 %v826_v37  ;;  %707 = vmatprep.subr.mxu1 %v826_v37 }
  0xaa   :  { %412 = vmax.xlane.f32.xlu1 %v411_v38  ;;  %132 = vmax.xlane.f32.xlu0 %v131_v41  ;;  %v57_v41 = vld [vmem:[%s1215_s2 + $0x28] sm:$0xff] }
  0xab   :  { %673 = vmatpush3.msra.mxu0 %v57_v41  ;;  %684 = vmatprep.mubr.msk.f32.mxu0 %vm827_vm1, %v826_v37 }
  0xac   :  { %674 = vmatprep.subr.mxu0 %v826_v37  ;;  %719 = vmatprep.mubr.msk.f32.mxu1 %vm827_vm1, %v826_v37 }
  0xae   :  { %415 = vmax.xlane.f32.xlu1 %v414_v44  ;;  %v626_v44 = vld [vmem:[%s1215_s2 + $0x60] sm:$0xff] }
  0xaf   :  { %708 = vmatpush3.msra.mxu1 %v626_v44 }
  0xb0   :  { %709 = vmatprep.subr.mxu1 %v826_v37 }
 0x11b   :  { %v398_v45 = vpop.xlane.xlu1 %397  ;;  %v115_v46 = vpop.xlane.xlu0 %114 }
 0x11c   :  { %v417_v47 = vsub.f32 %v871_v29, %v398_v45  ;;  %v134_v48 = vsub.f32 %v873_v30, %v115_v46  ;;  %v56_v46 = vld [vmem:[%s1215_s2 + $0x20] sm:$0xff] }
 0x11d   :  { %675 = vmatpush3.msra.mxu0 %v56_v46 }
 0x11e   :  { %v424_v49 = vmul.f32 1.442695, %v417_v47  ;;  %v141_v50 = vmul.f32 1.442695, %v134_v48  ;;  %v625_v47 = vld [vmem:[%s1215_s2 + $0x58] sm:$0xff]  ;;  %676 = vmatprep.subr.mxu0 %v826_v37 }
 0x11f   :  { %v118_v51 = vpop.xlane.xlu1 %117  ;;  %710 = vmatpush3.msra.mxu1 %v625_v47 }
 0x120   :  { %745 = vpow2.f32 %v424_v49  ;;  %v135_v52 = vsub.f32 %v888_v42, %v118_v51  ;;  %v55_v51 = vld [vmem:[%s1215_s2 + $0x18] sm:$0xff]  ;;  %711 = vmatprep.subr.mxu1 %v826_v37 }
 0x121   :  { %747 = vpow2.f32 %v141_v50  ;;  %677 = vmatpush3.msra.mxu0 %v55_v51 }
 0x122   :  { %v143_v53 = vmul.f32 1.442695, %v135_v52  ;;  %v624_v52 = vld [vmem:[%s1215_s2 + $0x50] sm:$0xff]  ;;  %678 = vmatprep.subr.mxu0 %v826_v37 }
 0x123   :  { %v401_v54 = vpop.xlane.xlu1 %400  ;;  %v121_v57 = vpop.xlane.xlu0 %120  ;;  %712 = vmatpush3.msra.mxu1 %v624_v52 }
 0x124   :  { %749 = vpow2.f32 %v143_v53  ;;  %v418_v58 = vsub.f32 %v890_v43, %v401_v54  ;;  %v136_v59 = vsub.f32 %v905_v55, %v121_v57  ;;  %v54_v54 = vld [vmem:[%s1215_s2 + $0x10] sm:$0xff]  ;;  %713 = vmatprep.subr.mxu1 %v826_v37 }
 0x125   :  { %679 = vmatpush3.msra.mxu0 %v54_v54 }
 0x126   :  { %v426_v60 = vmul.f32 1.442695, %v418_v58  ;;  %v145_v61 = vmul.f32 1.442695, %v136_v59  ;;  %v623_v58 = vld [vmem:[%s1215_s2 + $0x48] sm:$0xff]  ;;  %680 = vmatprep.subr.mxu0 %v826_v37 }
 0x127   :  { %v404_v29 = vpop.xlane.xlu1 %403  ;;  %v124_v62 = vpop.xlane.xlu0 %123  ;;  %714 = vmatpush3.msra.mxu1 %v623_v58 }
 0x128   :  { %751 = vpow2.f32 %v426_v60  ;;  %v419_v30 = vsub.f32 %v907_v56, %v404_v29  ;;  %v137_v63 = vsub.f32 %v922_v4, %v124_v62  ;;  %v53_v29 = vld [vmem:[%s1215_s2 + $0x8] sm:$0xff]  ;;  %v622_v62 = vld [vmem:[%s1215_s2 + $0x40] sm:$0xff]  ;;  %715 = vmatprep.subr.mxu1 %v826_v37 }
 0x129   :  { %753 = vpow2.f32 %v145_v61  ;;  %681 = vmatpush3.msra.mxu0 %v53_v29  ;;  %716 = vmatpush3.msra.mxu1 %v622_v62 }
 0x12a   :  { %v428_v42 = vmul.f32 1.442695, %v419_v30  ;;  %v147_v0 = vmul.f32 1.442695, %v137_v63  ;;  %v52_v63 = vld [vmem:[%s1215_s2] sm:$0xff]  ;;  %682 = vmatprep.subr.mxu0 %v826_v37  ;;  %717 = vmatprep.subr.mxu1 %v826_v37 }
 0x12b   :  { %v407_v1 = vpop.xlane.xlu1 %406  ;;  %v127_v2 = vpop.xlane.xlu0 %126  ;;  %683 = vmatpush3.msra.mxu0 %v52_v63 }
 0x12c   :  { %755 = vpow2.f32 %v428_v42  ;;  %v420_v3 = vsub.f32 %v924_v5, %v407_v1  ;;  %v138_v43 = vsub.f32 %v939_v17, %v127_v2 }
 0x12d   :  { %v984_v55 = vpop.eup %745  ;;  %757 = vpow2.f32 %v147_v0  ;;  %v621_v0 = vld [vmem:[%s1215_s2 + $0x38] sm:$0xff] }
 0x12e   :  { %v986_v6 = vpop.eup %747  ;;  %v430_v7 = vmul.f32 1.442695, %v420_v3  ;;  %v149_v8 = vmul.f32 1.442695, %v138_v43  ;;  %v438_v56 = vsel %vm112_vm0, %v984_v55, 0.0  ;;  %718 = vmatpush3.msra.mxu1 %v621_v0 }
 0x12f   :  { %439 = vadd.xlane.f32.xlu1 %v438_v56  ;;  %v410_v4 = vpop.xlane.xlu1 %409  ;;  %v155_v9 = vsel %vm112_vm0, %v986_v6, 0.0  ;;  %v130_v10 = vpop.xlane.xlu0 %129 }
 0x130   :  { %759 = vpow2.f32 %v430_v7  ;;  %v421_v5 = vsub.f32 %v941_v18, %v410_v4  ;;  %156 = vadd.xlane.f32.xlu0 %v155_v9  ;;  %v139_v11 = vsub.f32 %v956_v32, %v130_v10 }
 0x131   :  { %v994_v12 = vpop.eup %749  ;;  %761 = vpow2.f32 %v149_v8 }
 0x132   :  { %v432_v13 = vmul.f32 1.442695, %v421_v5  ;;  %v151_v14 = vmul.f32 1.442695, %v139_v11  ;;  %v158_v15 = vsel %vm112_vm0, %v994_v12, 0.0 }
 0x133   :  { %v413_v16 = vpop.xlane.xlu1 %412  ;;  %v133_v17 = vpop.xlane.xlu0 %132 }
 0x134   :  { %763 = vpow2.f32 %v432_v13  ;;  %v422_v19 = vsub.f32 %v958_v33, %v413_v16  ;;  %159 = vadd.xlane.f32.xlu0 %v158_v15  ;;  %v140_v20 = vsub.f32 %v967_v39, %v133_v17 }
 0x135   :  { %v1000_v18 = vpop.eup %751  ;;  %765 = vpow2.f32 %v151_v14 }
 0x136   :  { %v1002_v21 = vpop.eup %753  ;;  %v434_v22 = vmul.f32 1.442695, %v422_v19  ;;  %v153_v23 = vmul.f32 1.442695, %v140_v20  ;;  %v441_v24 = vsel %vm112_vm0, %v1000_v18, 0.0 }
 0x137   :  { %442 = vadd.xlane.f32.xlu1 %v441_v24  ;;  %v416_v25 = vpop.xlane.xlu1 %415  ;;  %v161_v26 = vsel %vm112_vm0, %v1002_v21, 0.0 }
 0x138   :  { %767 = vpow2.f32 %v434_v22  ;;  %v423_v27 = vsub.f32 %v969_v40, %v416_v25  ;;  %162 = vadd.xlane.f32.xlu0 %v161_v26 }
 0x139   :  { %v1009_v28 = vpop.eup %755  ;;  %769 = vpow2.f32 %v153_v23 }
 0x13a   :  { %v1011_v31 = vpop.eup %757  ;;  %v436_v32 = vmul.f32 1.442695, %v423_v27  ;;  %v444_v33 = vsel %vm112_vm0, %v1009_v28, 0.0 }
 0x13b   :  { %445 = vadd.xlane.f32.xlu1 %v444_v33  ;;  %v164_v36 = vsel %vm112_vm0, %v1011_v31, 0.0 }
 0x13c   :  { %771 = vpow2.f32 %v436_v32  ;;  %165 = vadd.xlane.f32.xlu0 %v164_v36 }
 0x13d   :  { %v1025_v38 = vpop.eup %759 }
 0x13e   :  { %v1027_v39 = vpop.eup %761  ;;  %v447_v40 = vsel %vm112_vm0, %v1025_v38, 0.0 }
 0x13f   :  { %448 = vadd.xlane.f32.xlu1 %v447_v40  ;;  %v167_v45 = vsel %vm112_vm0, %v1027_v39, 0.0 }
 0x140   :  { %168 = vadd.xlane.f32.xlu0 %v167_v45 }
 0x141   :  { %v1047_v48 = vpop.eup %763 }
 0x142   :  { %v1051_v49 = vpop.eup %765  ;;  %v450_v50 = vsel %vm112_vm0, %v1047_v48, 0.0 }
 0x143   :  { %451 = vadd.xlane.f32.xlu1 %v450_v50  ;;  %v170_v53 = vsel %vm112_vm0, %v1051_v49, 0.0 }
 0x144   :  { %171 = vadd.xlane.f32.xlu0 %v170_v53 }
 0x145   :  { %v1068_v57 = vpop.eup %767 }
 0x146   :  { %v1073_v59 = vpop.eup %769  ;;  %v453_v60 = vsel %vm112_vm0, %v1068_v57, 0.0 }
 0x147   :  { %454 = vadd.xlane.f32.xlu1 %v453_v60  ;;  %v173_v61 = vsel %vm112_vm0, %v1073_v59, 0.0 }
 0x148   :  { %174 = vadd.xlane.f32.xlu0 %v173_v61 }
 0x149   :  { %v1087_v30 = vpop.eup %771 }
 0x14a   :  { %v456_v42 = vsel %vm112_vm0, %v1087_v30, 0.0 }
 0x14b   :  { %457 = vadd.xlane.f32.xlu1 %v456_v42 }
 0x1b8   :  { %v440_v1 = vpop.xlane.xlu1 %439 }
 0x1b9   :  { %773 = vrcp.f32 %v440_v1  ;;  %v157_v2 = vpop.xlane.xlu0 %156 }
 0x1ba   :  { %775 = vrcp.f32 %v157_v2 }
 0x1bd   :  { %v160_v3 = vpop.xlane.xlu0 %159 }
 0x1be   :  { %777 = vrcp.f32 %v160_v3 }
 0x1c0   :  { %v443_v43 = vpop.xlane.xlu1 %442 }
 0x1c1   :  { %779 = vrcp.f32 %v443_v43  ;;  %v163_v7 = vpop.xlane.xlu0 %162 }
 0x1c2   :  { %781 = vrcp.f32 %v163_v7 }
 0x1c4   :  { %v446_v8 = vpop.xlane.xlu1 %445 }
 0x1c5   :  { %783 = vrcp.f32 %v446_v8  ;;  %v166_v56 = vpop.xlane.xlu0 %165 }
 0x1c6   :  { %v774_v4 = vpop.eup %773  ;;  %785 = vrcp.f32 %v166_v56 }
 0x1c7   :  { %v776_v9 = vpop.eup %775  ;;  %v466_v10 = vmul.f32 %v774_v4, %v984_v55 }
 0x1c8   :  { %v449_v5 = vpop.xlane.xlu1 %448  ;;  %v183_v11 = vmul.f32 %v776_v9, %v986_v6 }
 0x1c9   :  { %787 = vrcp.f32 %v449_v5  ;;  %v169_v13 = vpop.xlane.xlu0 %168  ;;  %720 = vmatmul.mubr.msk.f32.vlgmr.msra.gmra.mxu1 %vm112_vm0, %v466_v10 }
 0x1ca   :  { %789 = vrcp.f32 %v169_v13  ;;  %685 = vmatmul.mubr.msk.f32.vlgmr.msra.gmra.mxu0 %vm112_vm0, %v183_v11  ;;  %722 = vmatprep.mubr.msk.f32.mxu1 %vm827_vm1, %v826_v37 }
 0x1cb   :  { %v778_v14 = vpop.eup %777  ;;  %687 = vmatprep.mubr.msk.f32.mxu0 %vm827_vm1, %v826_v37 }
 0x1cc   :  { %v452_v15 = vpop.xlane.xlu1 %451  ;;  %v184_v55 = vmul.f32 %v778_v14, %v994_v12 }
 0x1cd   :  { %791 = vrcp.f32 %v452_v15  ;;  %v172_v16 = vpop.xlane.xlu0 %171 }
 0x1ce   :  { %v780_v6 = vpop.eup %779  ;;  %793 = vrcp.f32 %v172_v16  ;;  %688 = vmatmul.mubr.msk.f32.gmra.mxu0 %vm112_vm0, %v184_v55 }
 0x1cf   :  { %v782_v17 = vpop.eup %781  ;;  %690 = vmatprep.mubr.msk.f32.mxu0 %vm827_vm1, %v826_v37  ;;  %v467_v19 = vmul.f32 %v780_v6, %v1000_v18 }
 0x1d0   :  { %v455_v20 = vpop.xlane.xlu1 %454  ;;  %v185_v22 = vmul.f32 %v782_v17, %v1002_v21 }
 0x1d1   :  { %795 = vrcp.f32 %v455_v20  ;;  %v175_v23 = vpop.xlane.xlu0 %174  ;;  %723 = vmatmul.mubr.msk.f32.gmra.mxu1 %vm112_vm0, %v467_v19 }
 0x1d2   :  { %v784_v12 = vpop.eup %783  ;;  %797 = vrcp.f32 %v175_v23  ;;  %691 = vmatmul.mubr.msk.f32.gmra.mxu0 %vm112_vm0, %v185_v22  ;;  %725 = vmatprep.mubr.msk.f32.mxu1 %vm827_vm1, %v826_v37 }
 0x1d3   :  { %v786_v24 = vpop.eup %785  ;;  %693 = vmatprep.mubr.msk.f32.mxu0 %vm827_vm1, %v826_v37  ;;  %v468_v18 = vmul.f32 %v784_v12, %v1009_v28 }
 0x1d4   :  { %v458_v25 = vpop.xlane.xlu1 %457  ;;  %v186_v21 = vmul.f32 %v786_v24, %v1011_v31 }
 0x1d5   :  { %799 = vrcp.f32 %v458_v25  ;;  %726 = vmatmul.mubr.msk.f32.gmra.mxu1 %vm112_vm0, %v468_v18 }
 0x1d6   :  { %v788_v26 = vpop.eup %787  ;;  %694 = vmatmul.mubr.msk.f32.gmra.mxu0 %vm112_vm0, %v186_v21  ;;  %728 = vmatprep.mubr.msk.f32.mxu1 %vm827_vm1, %v826_v37 }
 0x1d7   :  { %v790_v27 = vpop.eup %789  ;;  %696 = vmatprep.mubr.msk.f32.mxu0 %vm827_vm1, %v826_v37  ;;  %v469_v32 = vmul.f32 %v788_v26, %v1025_v38 }
 0x1d8   :  { %v187_v28 = vmul.f32 %v790_v27, %v1027_v39 }
 0x1d9   :  { %729 = vmatmul.mubr.msk.f32.gmra.mxu1 %vm112_vm0, %v469_v32 }
 0x1da   :  { %v792_v31 = vpop.eup %791  ;;  %697 = vmatmul.mubr.msk.f32.gmra.mxu0 %vm112_vm0, %v187_v28  ;;  %731 = vmatprep.mubr.msk.f32.mxu1 %vm827_vm1, %v826_v37 }
 0x1db   :  { %v794_v33 = vpop.eup %793  ;;  %699 = vmatprep.mubr.msk.f32.mxu0 %vm827_vm1, %v826_v37  ;;  %v470_v34 = vmul.f32 %v792_v31, %v1047_v48 }
 0x1dc   :  { %v188_v35 = vmul.f32 %v794_v33, %v1051_v49 }
 0x1dd   :  { %732 = vmatmul.mubr.msk.f32.gmra.mxu1 %vm112_vm0, %v470_v34 }
 0x1de   :  { %v796_v36 = vpop.eup %795  ;;  %700 = vmatmul.mubr.msk.f32.gmra.mxu0 %vm112_vm0, %v188_v35  ;;  %734 = vmatprep.mubr.msk.f32.mxu1 %vm827_vm1, %v826_v37 }
 0x1df   :  { %v798_v38 = vpop.eup %797  ;;  %702 = vmatprep.mubr.msk.f32.mxu0 %vm827_vm1, %v826_v37  ;;  %v471_v39 = vmul.f32 %v796_v36, %v1068_v57 }
 0x1e0   :  { %v189_v40 = vmul.f32 %v798_v38, %v1073_v59 }
 0x1e1   :  { %735 = vmatmul.mubr.msk.f32.gmra.mxu1 %vm112_vm0, %v471_v39 }
 0x1e2   :  { %v800_v41 = vpop.eup %799  ;;  %703 = vmatmul.mubr.msk.f32.gmra.mxu0 %vm112_vm0, %v189_v40  ;;  %737 = vmatprep.mubr.msk.f32.mxu1 %vm827_vm1, %v826_v37 }
 0x1e3   :  { %v472_v44 = vmul.f32 %v800_v41, %v1087_v30 }
 0x1e5   :  { %738 = vmatmul.mubr.msk.f32.gmra.mxu1 %vm112_vm0, %v472_v44 }
 0x289   :  { %v560_v45 = vpop.f32.mrf.mxu1 }
 0x28a   :  { %v277_v46 = vpop.f32.mrf.mxu0  ;;  %635 = vst.msk [vmem:[%s1217_s4 + $0x38] sm:$0xff] %vm311_vm2, %v560_v45 }
 0x28b   :  { %312 = vst.msk [vmem:[%s1217_s4] sm:$0xff] %vm311_vm2, %v277_v46  ;;  %v721_v47 = vpop.f32.mrf.mxu1 }
 0x28c   :  { %v686_v48 = vpop.f32.mrf.mxu0 }
 0x28e   :  { %v282_v37 = vpop.f32.mrf.mxu0 }
 0x28f   :  { %313 = vst.msk [vmem:[%s1217_s4 + $0x8] sm:$0xff] %vm311_vm2, %v282_v37 }
 0x290   :  { %v689_v49 = vpop.f32.mrf.mxu0 }
 0x291   :  { %v565_v50 = vpop.f32.mrf.mxu1 }
 0x292   :  { %v287_v51 = vpop.f32.mrf.mxu0  ;;  %636 = vst.msk [vmem:[%s1217_s4 + $0x40] sm:$0xff] %vm311_vm2, %v565_v50 }
 0x293   :  { %314 = vst.msk [vmem:[%s1217_s4 + $0x10] sm:$0xff] %vm311_vm2, %v287_v51  ;;  %v724_v52 = vpop.f32.mrf.mxu1 }
 0x294   :  { %v692_v53 = vpop.f32.mrf.mxu0 }
 0x295   :  { %v570_v54 = vpop.f32.mrf.mxu1 }
 0x296   :  { %v292_v57 = vpop.f32.mrf.mxu0  ;;  %637 = vst.msk [vmem:[%s1217_s4 + $0x48] sm:$0xff] %vm311_vm2, %v570_v54 }
 0x297   :  { %315 = vst.msk [vmem:[%s1217_s4 + $0x18] sm:$0xff] %vm311_vm2, %v292_v57  ;;  %v727_v58 = vpop.f32.mrf.mxu1 }
 0x298   :  { %v695_v59 = vpop.f32.mrf.mxu0 }
 0x299   :  { %v575_v60 = vpop.f32.mrf.mxu1 }
 0x29a   :  { %v297_v61 = vpop.f32.mrf.mxu0  ;;  %638 = vst.msk [vmem:[%s1217_s4 + $0x50] sm:$0xff] %vm311_vm2, %v575_v60 }
 0x29b   :  { %316 = vst.msk [vmem:[%s1217_s4 + $0x20] sm:$0xff] %vm311_vm2, %v297_v61  ;;  %v730_v29 = vpop.f32.mrf.mxu1 }
 0x29c   :  { %v698_v62 = vpop.f32.mrf.mxu0 }
 0x29d   :  { %v580_v30 = vpop.f32.mrf.mxu1 }
 0x29e   :  { %v302_v63 = vpop.f32.mrf.mxu0  ;;  %639 = vst.msk [vmem:[%s1217_s4 + $0x58] sm:$0xff] %vm311_vm2, %v580_v30 }
 0x29f   :  { %317 = vst.msk [vmem:[%s1217_s4 + $0x28] sm:$0xff] %vm311_vm2, %v302_v63  ;;  %v733_v42 = vpop.f32.mrf.mxu1 }
 0x2a0   :  { %v701_v0 = vpop.f32.mrf.mxu0 }
 0x2a1   :  { %v585_v1 = vpop.f32.mrf.mxu1 }
 0x2a2   :  { %v307_v2 = vpop.f32.mrf.mxu0  ;;  %640 = vst.msk [vmem:[%s1217_s4 + $0x60] sm:$0xff] %vm311_vm2, %v585_v1 }
 0x2a3   :  { %318 = vst.msk [vmem:[%s1217_s4 + $0x30] sm:$0xff] %vm311_vm2, %v307_v2  ;;  %v736_v3 = vpop.f32.mrf.mxu1 }
 0x2a4   :  { %v704_v43 = vpop.f32.mrf.mxu0 }
 0x2a5   :  { %v590_v7 = vpop.f32.mrf.mxu1 }
 0x2a6   :  { %641 = vst.msk [vmem:[%s1217_s4 + $0x68] sm:$0xff] %vm311_vm2, %v590_v7 }
 0x2a7   :  { %v739_v8 = vpop.f32.mrf.mxu1 }
 0x2a8   :  { %606 = vsyncpa [#allocation3], 1 }

</bundles_post_ra>
